<compile_context>
chip_gen: v5e
topology: v5e:2x2
jax: 0.10.0
libtpu: 0.0.40
codegen_flags: <defaults>
</compile_context>

<pallas_src>
import functools

import jax
import jax.numpy as jnp
from jax.experimental import pallas as pl
from jax.experimental.pallas import tpu as pltpu

LANES = 128
MAX_TILE_ROWS = 1024  # memory-bound sweet spot (sweep 512-2048); ~0.5 MiB/tile f32


def _cdiv(a, b):
    return -(-a // b)


def _round_up(a, b):
    return _cdiv(a, b) * b


def _sublane_multiple(dtype):
    # f32 -> 8, bf16/f16 -> 16, int8/fp8 -> 32
    return max(8, 32 // jnp.dtype(dtype).itemsize)


def _mse_kernel(x_ref, t_ref, loss_ref, acc_ref):
    s = pl.program_id(1)

    @pl.when(s == 0)
    def _init():
        acc_ref[...] = jnp.zeros_like(acc_ref)

    # Cast in-register; inputs stay in their native dtype in HBM.
    diff = x_ref[...].astype(jnp.float32) - t_ref[...].astype(jnp.float32)
    acc_ref[...] += diff * diff  # lane-resident partial sums (VPU only)

    @pl.when(s == pl.num_programs(1) - 1)
    def _finalize():
        # Single cross-lane/sublane reduce per core, at the very end.
        loss_ref[0, 0] = jnp.sum(acc_ref[...])


@jax.jit
def content_loss_forward(x, target):
    """Returns (input_passthrough, mse_loss) matching ContentLoss.forward:
    `self.loss` is the MSE over all elements; the input is returned unchanged."""
    n = x.size
    sub = max(_sublane_multiple(x.dtype), _sublane_multiple(target.dtype))

    rows = _cdiv(n, LANES)
    tile_rows = min(_round_up(rows, sub), _round_up(MAX_TILE_ROWS, sub))
    blocks = _cdiv(rows, tile_rows)

    # Shard the row range across 2 TensorCores when there is enough work
    # (v7x megacore); degenerates to a single serial chunk otherwise.
    ncores = 2 if blocks >= 2 else 1
    steps = _cdiv(blocks, ncores)
    padded_rows = ncores * steps * tile_rows
    padded_n = padded_rows * LANES

    def _prep(a):
        flat = a.reshape(-1)
        if padded_n != n:  # pad only when needed; aligned case is copy-free
            flat = jnp.pad(flat, (0, padded_n - n))
        return flat.reshape(padded_rows, LANES)

    x2d = _prep(x)
    t2d = _prep(target)

    in_map = lambda c, s: (c * steps + s, 0)

    partials = pl.pallas_call(
        _mse_kernel,
        out_shape=jax.ShapeDtypeStruct((ncores, 1), jnp.float32),
        grid_spec=pltpu.PrefetchScalarGridSpec(
            num_scalar_prefetch=0,
            grid=(ncores, steps),
            in_specs=[
                pl.BlockSpec((tile_rows, LANES), in_map),
                pl.BlockSpec((tile_rows, LANES), in_map),
            ],
            out_specs=pl.BlockSpec(
                (1, 1), lambda c, s: (c, 0), memory_space=pltpu.SMEM
            ),
            scratch_shapes=[pltpu.VMEM((tile_rows, LANES), jnp.float32)],
        ),
        compiler_params=pltpu.CompilerParams(
            # core axis parallel (v7x 2-TC sharding), reduction axis arbitrary
            dimension_semantics=("parallel", "arbitrary"),
            # budget against the smallest generation (v7x: 64 MiB physical);
            # usage here is ~3 MiB so this leaves ample headroom.
            vmem_limit_bytes=32 * 1024 * 1024,
        ),
    )(x2d, t2d)

    loss = jnp.sum(partials) / n

    # forward() returns the input untouched; the loss is the side value.
    # TODO(synk): nn.Module stores `self.loss` as module state; here it is
    # returned as a second output instead.
    return x, loss


if __name__ == "__main__":
    key = jax.random.PRNGKey(0)
    k1, k2 = jax.random.split(key)
    # NCHW, small shapes consistent with an image feature map.
    x = jax.random.normal(k1, (2, 4, 16, 16), dtype=jnp.float32)
    target = jax.random.normal(k2, (2, 4, 16, 16), dtype=jnp.float32)

    out, loss = content_loss_forward(x, target)
    jax.block_until_ready((out, loss))

    # sanity check against plain-JAX reference
    ref_loss = jnp.mean((x - target) ** 2)
    assert jnp.allclose(loss, ref_loss, rtol=1e-5, atol=1e-6), (loss, ref_loss)
    assert jnp.array_equal(out, x)

    print("KERNEL_OK")
</pallas_src>

<mosaic_0001>
module attributes {stable_mosaic.version = 11 : i64} {
  func.func @_mse_kernel(%arg0: i32, %arg1: i32, %arg2: memref<16x128xf32, #tpu.memory_space<vmem>>, %arg3: memref<16x128xf32, #tpu.memory_space<vmem>>, %arg4: memref<1x1xf32, #tpu.memory_space<smem>>, %arg5: memref<16x128xf32, #tpu.memory_space<vmem>>) attributes {dimension_semantics = [#tpu.dimension_semantics<parallel>, #tpu.dimension_semantics<arbitrary>], iteration_bounds = array<i64: 1, 1>, scalar_prefetch = 0 : i64, scratch_operands = 1 : i64, tpu.core_type = #tpu.core_type<tc>, window_params = [{transform_indices = @transform_0, window_bounds = array<i64: 16, 128>}, {transform_indices = @transform_1, window_bounds = array<i64: 16, 128>}, {transform_indices = @transform_2, window_bounds = array<i64: 1, 1>}]} {
    %c0_i32 = arith.constant 0 : i32
    %0 = arith.cmpi eq, %arg1, %c0_i32 : i32
    %1 = arith.extui %0 : i1 to i32
    %c0_i32_0 = arith.constant 0 : i32
    %2 = arith.cmpi ne, %1, %c0_i32_0 : i32
    scf.if %2 {
      %cst = arith.constant 0.000000e+00 : f32
      %13 = vector.broadcast %cst : f32 to vector<16x128xf32>
      %c0_10 = arith.constant 0 : index
      %c0_11 = arith.constant 0 : index
      %14 = vector.load %arg5[%c0_10, %c0_11] : memref<16x128xf32, #tpu.memory_space<vmem>>, vector<16x128xf32>
      tpu.vector_store %arg5[%c0_10, %c0_11], %13 {strides = array<i32>} : memref<16x128xf32, #tpu.memory_space<vmem>>, vector<16x128xf32>,
    } else {
    }
    %c0 = arith.constant 0 : index
    %c0_1 = arith.constant 0 : index
    %3 = vector.load %arg2[%c0, %c0_1] : memref<16x128xf32, #tpu.memory_space<vmem>>, vector<16x128xf32>
    %c0_2 = arith.constant 0 : index
    %c0_3 = arith.constant 0 : index
    %4 = vector.load %arg3[%c0_2, %c0_3] : memref<16x128xf32, #tpu.memory_space<vmem>>, vector<16x128xf32>
    %5 = arith.subf %3, %4 : vector<16x128xf32>
    %c0_4 = arith.constant 0 : index
    %c0_5 = arith.constant 0 : index
    %6 = vector.load %arg5[%c0_4, %c0_5] : memref<16x128xf32, #tpu.memory_space<vmem>>, vector<16x128xf32>
    %7 = arith.mulf %5, %5 : vector<16x128xf32>
    %8 = arith.addf %6, %7 : vector<16x128xf32>
    %c0_6 = arith.constant 0 : index
    %c0_7 = arith.constant 0 : index
    %9 = vector.load %arg5[%c0_6, %c0_7] : memref<16x128xf32, #tpu.memory_space<vmem>>, vector<16x128xf32>
    tpu.vector_store %arg5[%c0_6, %c0_7], %8 {strides = array<i32>} : memref<16x128xf32, #tpu.memory_space<vmem>>, vector<16x128xf32>,
    %c0_i32_8 = arith.constant 0 : i32
    %10 = arith.cmpi eq, %arg1, %c0_i32_8 : i32
    %11 = arith.extui %10 : i1 to i32
    %c0_i32_9 = arith.constant 0 : i32
    %12 = arith.cmpi ne, %11, %c0_i32_9 : i32
    scf.if %12 {
      %c0_10 = arith.constant 0 : index
      %c0_11 = arith.constant 0 : index
      %13 = vector.load %arg5[%c0_10, %c0_11] : memref<16x128xf32, #tpu.memory_space<vmem>>, vector<16x128xf32>
      %14 = vector.shape_cast %13 : vector<16x128xf32> to vector<1x16x128xf32>
      %cst = arith.constant dense<0.000000e+00> : vector<1xf32>
      %15 = vector.multi_reduction <add>, %14, %cst [1, 2] : vector<1x16x128xf32> to vector<1xf32>
      %16 = vector.shape_cast %15 : vector<1xf32> to vector<1x1x1xf32>
      %17 = vector.extract %16[0, 0, 0] : f32 from vector<1x1x1xf32>
      %c0_12 = arith.constant 0 : index
      %c0_13 = arith.constant 0 : index
      %18 = memref.load %arg4[%c0_12, %c0_13] : memref<1x1xf32, #tpu.memory_space<smem>>
      memref.store %17, %arg4[%c0_12, %c0_13] : memref<1x1xf32, #tpu.memory_space<smem>>
    } else {
    }
    return
  }
  func.func @transform_0(%arg0: i32, %arg1: i32) -> (i32, i32) {
    %c1_i32 = arith.constant 1 : i32
    %0 = arith.muli %arg0, %c1_i32 : i32
    %1 = arith.addi %0, %arg1 : i32
    %c0_i32 = arith.constant 0 : i32
    %c0_i32_0 = arith.constant 0 : i32
    return %1, %c0_i32 : i32, i32
  }
  func.func @transform_1(%arg0: i32, %arg1: i32) -> (i32, i32) {
    %c1_i32 = arith.constant 1 : i32
    %0 = arith.muli %arg0, %c1_i32 : i32
    %1 = arith.addi %0, %arg1 : i32
    %c0_i32 = arith.constant 0 : i32
    %c0_i32_0 = arith.constant 0 : i32
    return %1, %c0_i32 : i32, i32
  }
  func.func @transform_2(%arg0: i32, %arg1: i32) -> (i32, i32) {
    %c0_i32 = arith.constant 0 : i32
    %c0_i32_0 = arith.constant 0 : i32
    return %arg0, %c0_i32 : i32, i32
  }
}

</mosaic_0001>

<bundles_post_ra>
// kernel: content_loss_forward.1
= control target key start
LH: loop header
LB: loop body
LE: loop exit
PB: predicated region body
PF: predicated region fallthrough
CT: control target
= control target key end

     0   :  { %s168_s0 = inlined_call_operand.vmem [shape: f32[16,128], index: 0, kind: input, shape index: {}]   ;;  %s169_s1 = inlined_call_operand.vmem [shape: f32[16,128], index: 1, kind: input, shape index: {}]   ;;  %s170_s2 = inlined_call_operand.hbm [shape: f32[1,1], index: 2, kind: output, shape index: {}]  }
   0x1   :  { %v62_v0 = vld [vmem:[%s168_s0] sm:$0xff]  ;;  %v63_v1 = vld [vmem:[%s168_s0 + $0x8] sm:$0xff] }
   0x2   :  { %v64_v2 = vld [vmem:[%s169_s1] sm:$0xff]  ;;  %v65_v3 = vld [vmem:[%s169_s1 + $0x8] sm:$0xff] }
   0x3   :  { %v66_v4 = vsub.f32 %v62_v0, %v64_v2 }
   0x4   :  { %7 = vsyncpa [#allocation4], 0  ;;  %v67_v5 = vsub.f32 %v63_v1, %v65_v3  ;;  %s98_s18 = sshll.u32 %s170_s2, 4  ;;  %s137_s19 = smov [#allocation3]   ;;  %s99_s18 = int_to_ptr.hbm [resolvable:$true] %s98_s18 }
   0x5   :  { %v70_v6 = vmul.f32 %v66_v4, %v66_v4 }
   0x6   :  { %v71_v7 = vmul.f32 %v67_v5, %v67_v5 }
   0x8   :  { %v81_v8 = vadd.f32 %v71_v7, %v70_v6 }
   0xa   :  { %82 = vadd.xlane.f32.xlu0 %v81_v8 }
  0x7d   :  { %v83_v9 = vpop.xlane.xlu0 %82 }
  0x7e   :  { %v84_v10 = vrot.slane %v83_v9, 4 }
  0x80   :  { %v85_v11 = vadd.f32 %v84_v10, %v83_v9 }
  0x82   :  { %v86_v12 = vrot.slane %v85_v11, 2 }
  0x84   :  { %v87_v13 = vadd.f32 %v86_v12, %v85_v11 }
  0x86   :  { %v88_v14 = vrot.slane %v87_v13, 1 }
  0x88   :  { %v89_v15 = vadd.f32 %v88_v14, %v87_v13 }
  0x8a   :  { %120 = vpush %v89_v15 }
  0xbb   :  { %s121_s1 = spop %120 }
  0xbc   :  { %92 = sst [smem:[#allocation3]] %s121_s1 }
  0xbd   :  { %101 = dma.smem_to_hbm %s137_s19, 16, %s99_s18, [#allocation4]  }
  0xbe   :  { %135 = dma.done.wait [#allocation4], 16  }
  0xbf   :  { %136 = vsyncadd [#allocation4], 4294967280 }
  0xc0   :  { %106 = sfence }
  0xc1   :  { %107 = vsyncpa [#allocation4], 1 }

</bundles_post_ra>
